<compile_context>
chip_gen: v7x
topology: tpu7x:2x2x1
jax: 0.10.0
libtpu: 0.0.40
codegen_flags: <defaults>
</compile_context>

<pallas_src>
import jax
import jax.numpy as jnp
from jax import lax
from jax.experimental import pallas as pl
from jax.experimental.pallas import tpu as pltpu


def _round_up(a: int, b: int) -> int:
    return -(-a // b) * b


# ----------------------------------------------------------------------------
# Pass 1: lane-dense input statistics only (column sums + Gram X^T X),
#         accumulated into resident output blocks.  Pure MXU + DMA.
# ----------------------------------------------------------------------------
def stats_kernel(x_ref, colsum_ref, gram_ref):
    @pl.when(pl.program_id(1) == 0)
    def _():
        colsum_ref[...] = jnp.zeros_like(colsum_ref)
        gram_ref[...] = jnp.zeros_like(gram_ref)

    xb = x_ref[...]
    colsum_ref[...] += jnp.sum(xb, axis=0, keepdims=True)
    # X^T X: contract the row axis (TN matmul, handled natively by the MXU).
    gram_ref[...] += lax.dot_general(
        xb, xb,
        dimension_numbers=(((0,), (0,)), ((), ())),
        preferred_element_type=jnp.float32)


# ----------------------------------------------------------------------------
# Pass 2: packed 1x1 conv (BN scale pre-folded into the weight) + shift +
#         softplus, lane-dense 128-wide output (unmasked full-width stores).
# ----------------------------------------------------------------------------
def conv_bn_softplus_kernel(x_ref, w_ref, shift_ref, o_ref):
    z = jnp.dot(x_ref[...], w_ref[...],
                preferred_element_type=jnp.float32) + shift_ref[...]
    # PyTorch softplus (beta=1, threshold=20): identity above the threshold.
    # exp() overflow in the not-taken branch gives +inf (never NaN) and is
    # discarded by the where, so no clamping min() is needed (saves VALU/EUP).
    o_ref[...] = jnp.where(z > 20.0, z, jnp.log1p(jnp.exp(z))).astype(o_ref.dtype)


def conv2d_gman(x, weight, bias, gamma, beta, *, eps=1e-5,
                tile_rows_stats=8192, tile_rows_out=4096):
    """x: (B, L, N, Fin).  weight: (Fout, Fin).  Returns (B, L, N, Fout)."""
    B, L, N, Fin = x.shape
    Fout = weight.shape[0]
    M = B * L * N

    x_flat = x.reshape(M * Fin).astype(jnp.float32)
    W = weight.astype(jnp.float32).T            # (Fin, Fout)
    b = bias.astype(jnp.float32)
    g = gamma.astype(jnp.float32)
    bt = beta.astype(jnp.float32)

    # ----------------- pass 1: column sums + Gram of x (lane-dense) ----------
    PACK_IN = 128 // Fin if (Fin <= 128 and 128 % Fin == 0) else 1
    LANES1 = PACK_IN * Fin
    rows1 = -(-M // PACK_IN)                                   # ceil(M / PACK_IN)
    tm1 = min(_round_up(tile_rows_stats, 8), _round_up(rows1, 8))
    n_tiles1 = _round_up(rows1, tm1) // tm1
    # Leading "parallel" split -> one partial-stat block per TensorCore (v7x).
    n_split = 2 if (n_tiles1 >= 2 and PACK_IN > 1) else 1
    tiles_per_split = -(-n_tiles1 // n_split)
    rows1_pad = n_split * tiles_per_split * tm1
    # Zero padding is exact for the stats (zero rows add nothing to sums/Gram).
    x1 = jnp.pad(x_flat, (0, rows1_pad * LANES1 - M * Fin)).reshape(
        rows1_pad, LANES1)

    colsum_p, gram_p = pl.pallas_call(
        stats_kernel,
        out_shape=(
            jax.ShapeDtypeStruct((n_split, LANES1), jnp.float32),
            jax.ShapeDtypeStruct((n_split * LANES1, LANES1), jnp.float32),
        ),
        grid_spec=pltpu.PrefetchScalarGridSpec(
            num_scalar_prefetch=0,
            grid=(n_split, tiles_per_split),
            in_specs=[
                pl.BlockSpec((tm1, LANES1),
                             lambda c, i: (c * tiles_per_split + i, 0)),
            ],
            out_specs=(
                pl.BlockSpec((1, LANES1), lambda c, i: (c, 0)),
                pl.BlockSpec((LANES1, LANES1), lambda c, i: (c, 0)),
            ),
        ),
        compiler_params=pltpu.CompilerParams(
            # NOTE(v7x): confirm in xprof that the leading axis shards across
            # both TensorCores; switch to CORE_PARALLEL if it does not.
            dimension_semantics=("parallel", "arbitrary"),
            vmem_limit_bytes=32 * 1024 * 1024),
    )(x1)

    # ----------------- per-channel glue (tiny, plain JAX) --------------------
    colsum = colsum_p.sum(axis=0)                                    # (LANES1,)
    gram = gram_p.reshape(n_split, LANES1, LANES1).sum(axis=0)       # (L1, L1)
    sum_x = colsum.reshape(PACK_IN, Fin).sum(axis=0)                 # (Fin,)
    # True Fin x Fin Gram = sum of the PACK_IN diagonal Fin x Fin blocks.
    G = jnp.einsum('aibj,ab->ij',
                   gram.reshape(PACK_IN, Fin, PACK_IN, Fin),
                   jnp.eye(PACK_IN, dtype=jnp.float32))              # (Fin, Fin)

    # BatchNorm training-mode batch stats of y = xW + bias (bias shifts only
    # the mean; it cancels in the normalization).
    # TODO(synk): E[y^2]-E[y]^2 in f32 can cancel for very large M or large
    #             means; a centered/compensated accumulation would be sturdier.
    sum_y = sum_x @ W                                                # (Fout,)
    WG = W.T @ G                                                     # (Fout, Fin)
    sumsq_y = jnp.sum(WG * W.T, axis=1)                              # (Fout,)
    mean_xw = sum_y / M
    var = jnp.maximum(sumsq_y / M - mean_xw * mean_xw, 0.0)
    inv_std = lax.rsqrt(var + eps)
    scale = g * inv_std                                              # (Fout,)
    shift = bt - mean_xw * scale                                     # (Fout,)

    # ----------------- pass 2: conv * scale + shift + softplus ---------------
    PACK_OUT = 128 // Fout if (Fout <= 128 and 128 % Fout == 0) else 1
    # TODO(synk): if Fout does not divide 128 the output is lane-sparse
    #             (masked stores); not the GMAN configuration (Fout=32).
    FP_IN, FP_OUT = PACK_OUT * Fin, PACK_OUT * Fout

    W_scaled = W * scale[None, :]                     # fold BN scale into weight
    w_bd = jnp.kron(jnp.eye(PACK_OUT, dtype=jnp.float32), W_scaled)  # (FP_IN, FP_OUT)
    shift_p = jnp.tile(shift, PACK_OUT)[None, :]                     # (1, FP_OUT)

    rows2 = -(-M // PACK_OUT)
    tm2 = min(_round_up(tile_rows_out, 8), _round_up(rows2, 8))
    rows2_pad = _round_up(rows2, tm2)
    x2 = jnp.pad(x_flat, (0, rows2_pad * FP_IN - M * Fin)).reshape(
        rows2_pad, FP_IN)

    # TODO(synk): emit bfloat16 here if the consumer tolerates it (halves the
    #             dominant output write traffic); kept f32 for exact parity.
    out_p = pl.pallas_call(
        conv_bn_softplus_kernel,
        out_shape=jax.ShapeDtypeStruct((rows2_pad, FP_OUT), x.dtype),
        grid_spec=pltpu.PrefetchScalarGridSpec(
            num_scalar_prefetch=0,
            grid=(rows2_pad // tm2,),
            in_specs=[
                pl.BlockSpec((tm2, FP_IN), lambda i: (i, 0)),
                pl.BlockSpec((FP_IN, FP_OUT), lambda i: (0, 0)),
                pl.BlockSpec((1, FP_OUT), lambda i: (0, 0)),
            ],
            out_specs=pl.BlockSpec((tm2, FP_OUT), lambda i: (i, 0)),
        ),
        compiler_params=pltpu.CompilerParams(
            dimension_semantics=("parallel",),
            vmem_limit_bytes=32 * 1024 * 1024),
    )(x2, w_bd, shift_p)

    # Unpack lanes, drop the padded tail; row-major (b, l, n) order matches the
    # PyTorch 'b f n l -> b l n f' final rearrange.
    out = out_p.reshape(rows2_pad * PACK_OUT, Fout)[:M]
    return out.reshape(B, L, N, Fout)


if __name__ == "__main__":
    # module config: in_features=4, out_features=32, kernel=(1,1), stride=(1,1)
    B, L, N, Fin, Fout = 2, 8, 16, 4, 32

    key = jax.random.PRNGKey(0)
    kx, kw = jax.random.split(key)

    x = jax.random.normal(kx, (B, L, N, Fin), dtype=jnp.float32)

    # Xavier-uniform init for conv weight (Fout, Fin, 1, 1).
    bound = (6.0 / (Fin + Fout)) ** 0.5
    weight = jax.random.uniform(kw, (Fout, Fin), dtype=jnp.float32,
                                minval=-bound, maxval=bound)
    bias = jnp.zeros((Fout,), jnp.float32)     # use_bias=True, zero init
    gamma = jnp.ones((Fout,), jnp.float32)     # BatchNorm2d affine init
    beta = jnp.zeros((Fout,), jnp.float32)

    out = conv2d_gman(x, weight, bias, gamma, beta)
    jax.block_until_ready(out)

    # Sanity check against a pure-JAX reference of the same math.
    y_ref = jnp.einsum("blnf,of->blno", x, weight) + bias
    y2 = y_ref.reshape(-1, Fout)
    m = y2.mean(0)
    v = ((y2 - m) ** 2).mean(0)
    yhat = (y_ref - m) / jnp.sqrt(v + 1e-5)
    ref = jnp.where(yhat > 20.0, yhat,
                    jnp.log1p(jnp.exp(jnp.minimum(yhat, 20.0))))
    assert out.shape == (B, L, N, Fout)
    assert jnp.allclose(out, ref, atol=1e-4, rtol=1e-4)

    print("KERNEL_OK")
</pallas_src>

<mosaic_0001>
module attributes {stable_mosaic.version = 11 : i64} {
  func.func @stats_kernel(%arg0: i32, %arg1: i32, %arg2: memref<8x128xf32, #tpu.memory_space<vmem>>, %arg3: memref<1x128xf32, #tpu.memory_space<vmem>>, %arg4: memref<128x128xf32, #tpu.memory_space<vmem>>) attributes {dimension_semantics = [#tpu.dimension_semantics<parallel>, #tpu.dimension_semantics<arbitrary>], iteration_bounds = array<i64: 1, 1>, scalar_prefetch = 0 : i64, scratch_operands = 0 : i64, tpu.core_type = #tpu.core_type<tc>, window_params = [{transform_indices = @transform_0, window_bounds = array<i64: 8, 128>}, {transform_indices = @transform_1, window_bounds = array<i64: 1, 128>}, {transform_indices = @transform_2, window_bounds = array<i64: 128, 128>}]} {
    %c0_i32 = arith.constant 0 : i32
    %0 = arith.cmpi eq, %arg1, %c0_i32 : i32
    %1 = arith.extui %0 : i1 to i32
    %c0_i32_0 = arith.constant 0 : i32
    %2 = arith.cmpi ne, %1, %c0_i32_0 : i32
    scf.if %2 {
      %cst_11 = arith.constant 0.000000e+00 : f32
      %13 = vector.broadcast %cst_11 : f32 to vector<1x128xf32>
      %c0_12 = arith.constant 0 : index
      %c0_13 = arith.constant 0 : index
      %14 = vector.load %arg3[%c0_12, %c0_13] : memref<1x128xf32, #tpu.memory_space<vmem>>, vector<1x128xf32>
      tpu.vector_store %arg3[%c0_12, %c0_13], %13 {strides = array<i32>} : memref<1x128xf32, #tpu.memory_space<vmem>>, vector<1x128xf32>,
      %cst_14 = arith.constant 0.000000e+00 : f32
      %15 = vector.broadcast %cst_14 : f32 to vector<128x128xf32>
      %c0_15 = arith.constant 0 : index
      %c0_16 = arith.constant 0 : index
      %16 = vector.load %arg4[%c0_15, %c0_16] : memref<128x128xf32, #tpu.memory_space<vmem>>, vector<128x128xf32>
      tpu.vector_store %arg4[%c0_15, %c0_16], %15 {strides = array<i32>} : memref<128x128xf32, #tpu.memory_space<vmem>>, vector<128x128xf32>,
    } else {
    }
    %c0 = arith.constant 0 : index
    %c0_1 = arith.constant 0 : index
    %3 = vector.load %arg2[%c0, %c0_1] : memref<8x128xf32, #tpu.memory_space<vmem>>, vector<8x128xf32>
    %c0_2 = arith.constant 0 : index
    %c0_3 = arith.constant 0 : index
    %4 = vector.load %arg3[%c0_2, %c0_3] : memref<1x128xf32, #tpu.memory_space<vmem>>, vector<1x128xf32>
    %cst = arith.constant dense<0.000000e+00> : vector<128xf32>
    %5 = vector.multi_reduction <add>, %3, %cst [0] : vector<8x128xf32> to vector<128xf32>
    %6 = vector.shape_cast %5 : vector<128xf32> to vector<1x128xf32>
    %7 = arith.addf %4, %6 : vector<1x128xf32>
    %c0_4 = arith.constant 0 : index
    %c0_5 = arith.constant 0 : index
    %8 = vector.load %arg3[%c0_4, %c0_5] : memref<1x128xf32, #tpu.memory_space<vmem>>, vector<1x128xf32>
    tpu.vector_store %arg3[%c0_4, %c0_5], %7 {strides = array<i32>} : memref<1x128xf32, #tpu.memory_space<vmem>>, vector<1x128xf32>,
    %c0_6 = arith.constant 0 : index
    %c0_7 = arith.constant 0 : index
    %9 = vector.load %arg4[%c0_6, %c0_7] : memref<128x128xf32, #tpu.memory_space<vmem>>, vector<128x128xf32>
    %cst_8 = arith.constant dense<0.000000e+00> : vector<128x128xf32>
    %10 = tpu.matmul %3, %3, %cst_8 {dimension_numbers = #tpu.dot_dimension_numbers<[0], [0], [1], [1], [0, 1, 1, 1], [], []>} : vector<8x128xf32>, vector<8x128xf32>, vector<128x128xf32> -> vector<128x128xf32>
    %11 = arith.addf %9, %10 : vector<128x128xf32>
    %c0_9 = arith.constant 0 : index
    %c0_10 = arith.constant 0 : index
    %12 = vector.load %arg4[%c0_9, %c0_10] : memref<128x128xf32, #tpu.memory_space<vmem>>, vector<128x128xf32>
    tpu.vector_store %arg4[%c0_9, %c0_10], %11 {strides = array<i32>} : memref<128x128xf32, #tpu.memory_space<vmem>>, vector<128x128xf32>,
    return
  }
  func.func @transform_0(%arg0: i32, %arg1: i32) -> (i32, i32) {
    %c1_i32 = arith.constant 1 : i32
    %0 = arith.muli %arg0, %c1_i32 : i32
    %1 = arith.addi %0, %arg1 : i32
    %c0_i32 = arith.constant 0 : i32
    %c0_i32_0 = arith.constant 0 : i32
    return %1, %c0_i32 : i32, i32
  }
  func.func @transform_1(%arg0: i32, %arg1: i32) -> (i32, i32) {
    %c0_i32 = arith.constant 0 : i32
    %c0_i32_0 = arith.constant 0 : i32
    return %arg0, %c0_i32 : i32, i32
  }
  func.func @transform_2(%arg0: i32, %arg1: i32) -> (i32, i32) {
    %c0_i32 = arith.constant 0 : i32
    %c0_i32_0 = arith.constant 0 : i32
    return %arg0, %c0_i32 : i32, i32
  }
}

</mosaic_0001>

<bundles_post_ra>
// kernel: tpu_custom_call.1
= control target key start
LH: loop header
LB: loop body
LE: loop exit
PB: predicated region body
PF: predicated region fallthrough
CT: control target
= control target key end

     0   :  { %8 = vsyncpa [#allocation3], 0  ;;  %s576_s0 = inlined_call_operand.hbm [shape: f32[8,128], index: 0, kind: input, shape index: {}]   ;;  %s577_s1 = inlined_call_operand.hbm [shape: f32[1,128], index: 1, kind: output, shape index: {0}]   ;;  %s578_s2 = inlined_call_operand.hbm [shape: f32[128,128], index: 2, kind: output, shape index: {1}]  }
   0x1   :  { %9 = vsyncpa [#allocation4], 0 }
   0x2   :  { %10 = vsyncpa [#allocation7], 0  ;;  %s503_s9 = smov [#allocation2]   ;;  %s431_s13 = scalar_lea.hbm %s576_s0, 128 }
   0x3   :  { %s20_s10 = sshll.u32 %s503_s9, 4  ;;  %p432_p0 = scmp.ne.s32.totalorder %s576_s0, %s431_s13  ;;  %s21_s10 = int_to_ptr.vmem [resolvable:$true] %s20_s10 }
   0x4   :  { %p435_p1 = scmp.lt.u32.totalorder %s431_s13, %s576_s0 }
   0x6   :  { %p437_p2 = pnand %p435_p1, %p432_p0 }
   0x8   :  { %440 = shalt.err (!%p437_p2)
}
   0x9   :  { %s441_s18 = scalar_lea.vmem %s21_s10, 128  ;;  %p446_p4 = scmp.lt.s32.totalorder %s21_s10, %s21_s10 }
   0xa   :  { %p442_p3 = scmp.ne.s32.totalorder %s21_s10, %s441_s18  ;;  %p447_p5 = scmp.lt.s32.totalorder %s441_s18, %s441_s18 }
   0xc   :  { %p448_p6 = por %p447_p5, %p446_p4 }
   0xe   :  { %p449_p7 = pnand %p448_p6, %p442_p3 }
  0x10   :  { %452 = shalt.err (!%p449_p7)
}
  0x11   :  { %23 = dma.hbm_to_vmem [thread:$0]  %s576_s0, 128, %s21_s10, [#allocation3]  }
  0x12   :  { %497 = dma.done.wait [#allocation3], 128  }
  0x13   :  { %498 = vsyncadd [#allocation3], 4294967168  ;;  %v49_v0 = vld [vmem:[#allocation2] sm:$0xff]  ;;  %v504_v1 = vmov 0.0   ;;  %vm107_vm0 = vcmask 64512   ;;  %s505_s0 = smov [#allocation5]  }
  0x14   :  { %75 = vxpose.xlu0.b32.start.end [1/1] (short) %v49_v0, 128  ;;  %397 = vmatprep.subr.mxu0 %v49_v0  ;;  %32 = vst [vmem:[#allocation5] sm:$0x1] %v504_v1  ;;  %v51_v18 = vrot.slane %v49_v0, 4  ;;  %s339_s21 = sshll.u32 %s505_s0, 4  ;;  %s340_s21 = int_to_ptr.vmem [resolvable:$true] %s339_s21 }
  0x15   :  { %398 = vmatpush3.msra.mxu0 %v49_v0  ;;  %423 = vmatprep.subr.mxu1 %v49_v0  ;;  %s453_s22 = scalar_lea.vmem %s340_s21, 16  ;;  %s457_s23 = scalar_lea.vmem %s340_s21, 32 }
  0x16   :  { %424 = vmatpush3.msra.mxu1 %v49_v0  ;;  %v52_v19 = vadd.f32 %v51_v18, %v49_v0  ;;  %p454_p8 = scmp.ne.s32.totalorder %s340_s21, %s453_s22  ;;  %p458_p9 = scmp.lt.s32.totalorder %s340_s21, %s340_s21 }
  0x17   :  { %p459_p10 = scmp.lt.s32.totalorder %s457_s23, %s453_s22 }
  0x18   :  { %v53_v20 = vrot.slane %v52_v19, 2 }
  0x19   :  { %p460_p11 = por %p459_p10, %p458_p9 }
  0x1a   :  { %v54_v21 = vadd.f32 %v53_v20, %v52_v19 }
  0x1b   :  { %v50_v24 = vld [vmem:[#allocation5] sm:$0x1]  ;;  %p461_p12 = pnand %p460_p11, %p454_p8 }
  0x1c   :  { %v55_v22 = vrot.slane %v54_v21, 1 }
  0x1e   :  { %v56_v23 = vadd.f32 %v55_v22, %v54_v21 }
  0x20   :  { %v57_v25 = vadd.f32 %v56_v23, %v50_v24 }
  0x22   :  { %58 = vst [vmem:[#allocation5] sm:$0x1] %v57_v25 }
  0x94   :  { %v91_v2 = vpop.trf.xlu0 }
  0x95   :  { %399 = vmatprep.mubr.msk.f32.mxu0 %vm107_vm0, %v91_v2 }
  0x98   :  { %v92_v3 = vpop.trf.xlu0 }
  0x99   :  { %400 = vmatmul.mubr.msk.f32.vlgmr.msra.gmra.mrb[0].mxu0 %vm107_vm0, %v92_v3 }
  0x9c   :  { %v93_v4 = vpop.trf.xlu0 }
  0x9d   :  { %402 = vmatprep.mubr.msk.f32.mxu0 %vm107_vm0, %v93_v4 }
  0xa0   :  { %v94_v5 = vpop.trf.xlu0 }
  0xa1   :  { %403 = vmatmul.mubr.msk.f32.gmra.mrb[2].mxu0 %vm107_vm0, %v94_v5 }
  0xa4   :  { %v95_v6 = vpop.trf.xlu0 }
  0xa5   :  { %405 = vmatprep.mubr.msk.f32.mxu0 %vm107_vm0, %v95_v6 }
  0xa8   :  { %v96_v7 = vpop.trf.xlu0 }
  0xa9   :  { %406 = vmatmul.mubr.msk.f32.gmra.mrb[4].mxu0 %vm107_vm0, %v96_v7 }
  0xac   :  { %v97_v8 = vpop.trf.xlu0 }
  0xad   :  { %408 = vmatprep.mubr.msk.f32.mxu0 %vm107_vm0, %v97_v8 }
  0xb0   :  { %v98_v9 = vpop.trf.xlu0 }
  0xb1   :  { %409 = vmatmul.mubr.msk.f32.gmra.mrb[6].mxu0 %vm107_vm0, %v98_v9 }
  0xb4   :  { %v99_v10 = vpop.trf.xlu0 }
  0xb5   :  { %411 = vmatprep.mubr.msk.f32.mxu1 %vm107_vm0, %v99_v10 }
  0xb8   :  { %v100_v11 = vpop.trf.xlu0 }
  0xb9   :  { %412 = vmatmul.mubr.msk.f32.vlgmr.msra.gmra.mrb[0].mxu1 %vm107_vm0, %v100_v11 }
  0xbc   :  { %v101_v12 = vpop.trf.xlu0 }
  0xbd   :  { %414 = vmatprep.mubr.msk.f32.mxu1 %vm107_vm0, %v101_v12 }
  0xc0   :  { %v102_v13 = vpop.trf.xlu0 }
  0xc1   :  { %415 = vmatmul.mubr.msk.f32.gmra.mrb[2].mxu1 %vm107_vm0, %v102_v13 }
  0xc4   :  { %v103_v14 = vpop.trf.xlu0 }
  0xc5   :  { %417 = vmatprep.mubr.msk.f32.mxu1 %vm107_vm0, %v103_v14 }
  0xc8   :  { %v104_v15 = vpop.trf.xlu0 }
  0xc9   :  { %418 = vmatmul.mubr.msk.f32.gmra.mrb[4].mxu1 %vm107_vm0, %v104_v15 }
  0xcc   :  { %v105_v16 = vpop.trf.xlu0 }
  0xcd   :  { %420 = vmatprep.mubr.msk.f32.mxu1 %vm107_vm0, %v105_v16 }
  0xd0   :  { %v106_v17 = vpop.trf.xlu0 }
  0xd1   :  { %421 = vmatmul.mubr.msk.f32.gmra.mrb[6].mxu1 %vm107_vm0, %v106_v17 }
  0xd2   :  { %464 = shalt.err (!%p461_p12)
}
  0xd3   :  { %s465_s26 = scalar_lea.hbm %s577_s1, 16 }
  0xd4   :  { %p466_p13 = scmp.ne.s32.totalorder %s577_s1, %s465_s26  ;;  %p469_p0 = scmp.lt.u32.totalorder %s465_s26, %s577_s1 }
  0xd6   :  { %p471_p1 = pnand %p469_p0, %p466_p13 }
  0xd8   :  { %474 = shalt.err (!%p471_p1)
}
  0xd9   :  { %342 = dma.vmem_to_hbm [thread:$0]  %s340_s21, 16, %s577_s1, [#allocation4]  }
  0xda   :  { %s506_s1 = smov [#allocation6]  }
  0xdb   :  { %s348_s5 = sshll.u32 %s506_s1, 4  ;;  %s349_s5 = int_to_ptr.vmem [resolvable:$true] %s348_s5 }
  0xdc   :  { %s475_s6 = scalar_lea.vmem %s349_s5, 2048  ;;  %p480_p3 = scmp.lt.s32.totalorder %s349_s5, %s349_s5 }
  0xdd   :  { %p476_p2 = scmp.ne.s32.totalorder %s349_s5, %s475_s6  ;;  %p481_p4 = scmp.lt.s32.totalorder %s475_s6, %s475_s6 }
  0xdf   :  { %p482_p5 = por %p481_p4, %p480_p3 }
  0xe1   :  { %p483_p6 = pnand %p482_p5, %p476_p2 }
 0x16c   :  { %v401_v26 = vpop.f32.mrb[0].mxu0 }
 0x16d   :  { %v222_v27 = vpop.f32.mrb[1].mxu0  ;;  %318 = vst [vmem:[#allocation6 + $0x8] sm:$0xff] %v401_v26 }
 0x16e   :  { %317 = vst [vmem:[#allocation6] sm:$0xff] %v222_v27 }
 0x174   :  { %v404_v28 = vpop.f32.mrb[2].mxu0 }
 0x175   :  { %v232_v29 = vpop.f32.mrb[3].mxu0  ;;  %320 = vst [vmem:[#allocation6 + $0x18] sm:$0xff] %v404_v28 }
 0x176   :  { %319 = vst [vmem:[#allocation6 + $0x10] sm:$0xff] %v232_v29 }
 0x17c   :  { %v407_v30 = vpop.f32.mrb[4].mxu0 }
 0x17d   :  { %v242_v31 = vpop.f32.mrb[5].mxu0  ;;  %322 = vst [vmem:[#allocation6 + $0x28] sm:$0xff] %v407_v30 }
 0x17e   :  { %321 = vst [vmem:[#allocation6 + $0x20] sm:$0xff] %v242_v31 }
 0x184   :  { %v410_v32 = vpop.f32.mrb[6].mxu0 }
 0x185   :  { %v252_v33 = vpop.f32.mrb[7].mxu0  ;;  %324 = vst [vmem:[#allocation6 + $0x38] sm:$0xff] %v410_v32 }
 0x186   :  { %323 = vst [vmem:[#allocation6 + $0x30] sm:$0xff] %v252_v33 }
 0x18c   :  { %v413_v34 = vpop.f32.mrb[0].mxu1 }
 0x18d   :  { %v262_v35 = vpop.f32.mrb[1].mxu1  ;;  %326 = vst [vmem:[#allocation6 + $0x48] sm:$0xff] %v413_v34 }
 0x18e   :  { %325 = vst [vmem:[#allocation6 + $0x40] sm:$0xff] %v262_v35 }
 0x194   :  { %v416_v36 = vpop.f32.mrb[2].mxu1 }
 0x195   :  { %v272_v37 = vpop.f32.mrb[3].mxu1  ;;  %328 = vst [vmem:[#allocation6 + $0x58] sm:$0xff] %v416_v36 }
 0x196   :  { %327 = vst [vmem:[#allocation6 + $0x50] sm:$0xff] %v272_v37 }
 0x19c   :  { %v419_v38 = vpop.f32.mrb[4].mxu1 }
 0x19d   :  { %v282_v39 = vpop.f32.mrb[5].mxu1  ;;  %330 = vst [vmem:[#allocation6 + $0x68] sm:$0xff] %v419_v38 }
 0x19e   :  { %329 = vst [vmem:[#allocation6 + $0x60] sm:$0xff] %v282_v39 }
 0x1a4   :  { %v422_v40 = vpop.f32.mrb[6].mxu1 }
 0x1a5   :  { %v292_v41 = vpop.f32.mrb[7].mxu1  ;;  %332 = vst [vmem:[#allocation6 + $0x78] sm:$0xff] %v422_v40 }
 0x1a6   :  { %331 = vst [vmem:[#allocation6 + $0x70] sm:$0xff] %v292_v41 }
 0x1a7   :  { %486 = shalt.err (!%p483_p6)
}
 0x1a8   :  { %s487_s9 = scalar_lea.hbm %s578_s2, 2048 }
 0x1a9   :  { %p488_p7 = scmp.ne.s32.totalorder %s578_s2, %s487_s9  ;;  %p491_p8 = scmp.lt.u32.totalorder %s487_s9, %s578_s2 }
 0x1ab   :  { %p493_p9 = pnand %p491_p8, %p488_p7 }
 0x1ad   :  { %496 = shalt.err (!%p493_p9)
}
 0x1ae   :  { %s507_s14 = smov 128   ;;  %s508_s15 = smov 8  }
 0x1af   :  { %354 = dma.vmem_to_hbm [thread:$0]  %s349_s5, 2048, %s578_s2, [#allocation7], %s507_s14, %s507_s14, %s508_s15  }
 0x1b0   :  { %499 = dma.done.wait [#allocation4], 16  }
 0x1b1   :  { %500 = vsyncadd [#allocation4], 4294967280 }
 0x1b2   :  { %501 = dma.done.wait [#allocation7], 2048  }
 0x1b3   :  { %502 = vsyncadd [#allocation7], 4294965248 }
 0x1b4   :  { %361 = vsyncpa [#allocation3], 1 }
 0x1b5   :  { %362 = vsyncpa [#allocation4], 1 }
 0x1b6   :  { %363 = vsyncpa [#allocation7], 1 }

</bundles_post_ra>
